<compile_context>
chip_gen: v6e
topology: v6e:2x2x1
jax: 0.10.0
libtpu: 0.0.40
codegen_flags: <defaults>
</compile_context>

<pallas_src>
import functools

import jax
import jax.numpy as jnp
from jax.experimental import pallas as pl
from jax.experimental.pallas import tpu as pltpu


def _triplet_loss_kernel(margin_ref, ap_ref, n_ref, out_ref, *, num_triplet, tile_t):
    # margin_ref: (1,1) SMEM scalar
    # ap_ref:     (tile_t, 2, D) VMEM tile -> [:,0,:] anchors, [:,1,:] positives
    # n_ref:      (tile_t, D)    VMEM tile of negatives
    # out_ref:    (1,1) SMEM accumulator, resident across the grid axis
    i = pl.program_id(0)

    @pl.when(i == 0)
    def _init():
        out_ref[0, 0] = jnp.float32(0.0)

    ap = ap_ref[...].astype(jnp.float32)          # (tile_t, 2, D)
    a = ap[:, 0, :]                               # (tile_t, D)
    p = ap[:, 1, :]                               # (tile_t, D)
    n = n_ref[...].astype(jnp.float32)            # (tile_t, D)

    margin = margin_ref[0, 0]

    # One multiply + one cross-lane reduce per row (instead of two dots).
    dot = jnp.sum(a * (p - n), axis=-1, keepdims=True)        # (tile_t, 1)
    hinge = jnp.maximum(margin - dot, 0.0)                    # (tile_t, 1)

    # Mask rows past the true T (partial last tile); otherwise they would each
    # contribute max(margin, 0) to the sum.
    row = i * tile_t + jax.lax.broadcasted_iota(jnp.int32, (tile_t, 1), 0)
    hinge = jnp.where(row < num_triplet, hinge, 0.0)

    out_ref[0, 0] += jnp.sum(hinge)

    @pl.when(i == pl.num_programs(0) - 1)
    def _finalize():
        out_ref[0, 0] = out_ref[0, 0] / jnp.float32(num_triplet)


def triplet_loss(embed, num_triplet, margin, *, tile_t=None):
    """Pallas implementation of TripletLoss.forward.

    embed:       (3*num_triplet, D) array; rows [0, 2T) are interleaved
                 (anchor, positive) pairs, rows [2T, 3T) are negatives.
    num_triplet: static Python int.
    margin:      Python float or scalar (runtime value; no recompile per value).
    """
    N, D = embed.shape
    T = int(num_triplet)
    assert N == 3 * T, f"expected embed to have 3*num_triplet rows, got {N} vs 3*{T}"

    # Contiguous slices (no strided gather): (T, 2, D) anchor/positive pairs + (T, D) negatives.
    ap = embed[: 2 * T].reshape(T, 2, D)
    neg = embed[2 * T:]

    if tile_t is None:
        # Largest convenient tile; 512 rows keeps double-buffered inputs well
        # under the default scoped-VMEM limit on v5e/v6e/v7x even at D=1024 f32.
        tile_t = T if T <= 512 else 512
    grid = (pl.cdiv(T, tile_t),)

    margin_arr = jnp.full((1, 1), margin, dtype=jnp.float32)

    kernel = functools.partial(_triplet_loss_kernel, num_triplet=T, tile_t=tile_t)

    out = pl.pallas_call(
        kernel,
        out_shape=jax.ShapeDtypeStruct((1, 1), jnp.float32),
        grid_spec=pltpu.PrefetchScalarGridSpec(
            num_scalar_prefetch=0,
            grid=grid,
            in_specs=[
                pl.BlockSpec(memory_space=pltpu.SMEM),              # margin scalar
                pl.BlockSpec((tile_t, 2, D), lambda i: (i, 0, 0)),  # anchor/positive pairs
                pl.BlockSpec((tile_t, D), lambda i: (i, 0)),        # negatives
            ],
            out_specs=pl.BlockSpec(memory_space=pltpu.SMEM),        # resident scalar accumulator
        ),
        compiler_params=pltpu.CompilerParams(
            dimension_semantics=("arbitrary",),   # reduction axis (output resident)
            vmem_limit_bytes=64 * 1024 * 1024,
        ),
    )(margin_arr, ap, neg)
    return out[0, 0]
    # TODO(synk): for v7x, shard the reduction into two partial sums (one per
    # TensorCore) and add them in the wrapper to use both cores' DMA engines.


def triplet_loss_ref(embed, num_triplet, margin):
    anchor = embed[0:2 * num_triplet:2]
    positive = embed[1:2 * num_triplet + 1:2]
    negative = embed[2 * num_triplet:]
    sim_ap = jnp.einsum('ij,ij->i', anchor, positive)
    sim_an = jnp.einsum('ij,ij->i', anchor, negative)
    return jnp.mean(jnp.maximum(margin + sim_an - sim_ap, 0.0))


if __name__ == "__main__":
    margin = 0.3

    # Case 1: small, single-tile (matches the module's expected small shapes).
    T1, D1 = 8, 32
    embed1 = jax.random.normal(jax.random.PRNGKey(0), (3 * T1, D1), dtype=jnp.float32)
    loss1 = triplet_loss(embed1, T1, margin)
    jax.block_until_ready(loss1)
    ref1 = triplet_loss_ref(embed1, T1, margin)
    assert jnp.allclose(loss1, ref1, atol=1e-5, rtol=1e-5), (loss1, ref1)

    # Case 2: multi-step grid with a partial last tile (exercises the SMEM
    # accumulator and the padded-row masking).
    T2, D2 = 10, 32
    embed2 = jax.random.normal(jax.random.PRNGKey(1), (3 * T2, D2), dtype=jnp.float32)
    loss2 = triplet_loss(embed2, T2, margin, tile_t=8)
    jax.block_until_ready(loss2)
    ref2 = triplet_loss_ref(embed2, T2, margin)
    assert jnp.allclose(loss2, ref2, atol=1e-5, rtol=1e-5), (loss2, ref2)

    print("KERNEL_OK")
</pallas_src>

<mosaic_0001>
module attributes {stable_mosaic.version = 11 : i64} {
  func.func @_triplet_loss_kernel(%arg0: i32, %arg1: memref<1x1xf32, #tpu.memory_space<smem>>, %arg2: memref<8x2x32xf32, #tpu.memory_space<vmem>>, %arg3: memref<8x32xf32, #tpu.memory_space<vmem>>, %arg4: memref<1x1xf32, #tpu.memory_space<smem>>) attributes {dimension_semantics = [#tpu.dimension_semantics<arbitrary>], iteration_bounds = array<i64: 1>, scalar_prefetch = 0 : i64, scratch_operands = 0 : i64, tpu.core_type = #tpu.core_type<tc>, window_params = [{transform_indices = @transform_0, window_bounds = array<i64: 1, 1>}, {transform_indices = @transform_1, window_bounds = array<i64: 8, 2, 32>}, {transform_indices = @transform_2, window_bounds = array<i64: 8, 32>}, {transform_indices = @transform_3, window_bounds = array<i64: 1, 1>}]} {
    %c0_i32 = arith.constant 0 : i32
    %0 = arith.cmpi eq, %arg0, %c0_i32 : i32
    %1 = arith.extui %0 : i1 to i32
    %c0_i32_0 = arith.constant 0 : i32
    %2 = arith.cmpi ne, %1, %c0_i32_0 : i32
    scf.if %2 {
      %cst_17 = arith.constant 0.000000e+00 : f32
      %c0_18 = arith.constant 0 : index
      %c0_19 = arith.constant 0 : index
      %36 = memref.load %arg4[%c0_18, %c0_19] : memref<1x1xf32, #tpu.memory_space<smem>>
      memref.store %cst_17, %arg4[%c0_18, %c0_19] : memref<1x1xf32, #tpu.memory_space<smem>>
    } else {
    }
    %c0 = arith.constant 0 : index
    %c0_1 = arith.constant 0 : index
    %c0_2 = arith.constant 0 : index
    %3 = vector.load %arg2[%c0, %c0_1, %c0_2] : memref<8x2x32xf32, #tpu.memory_space<vmem>>, vector<8x2x32xf32>
    %4 = vector.extract_strided_slice %3 {offsets = [0, 0, 0], sizes = [8, 1, 32], strides = [1, 1, 1]} : vector<8x2x32xf32> to vector<8x1x32xf32>
    %5 = vector.shape_cast %4 : vector<8x1x32xf32> to vector<8x32xf32>
    %6 = vector.extract_strided_slice %3 {offsets = [0, 1, 0], sizes = [8, 1, 32], strides = [1, 1, 1]} : vector<8x2x32xf32> to vector<8x1x32xf32>
    %7 = vector.shape_cast %6 : vector<8x1x32xf32> to vector<8x32xf32>
    %c0_3 = arith.constant 0 : index
    %c0_4 = arith.constant 0 : index
    %8 = vector.load %arg3[%c0_3, %c0_4] : memref<8x32xf32, #tpu.memory_space<vmem>>, vector<8x32xf32>
    %c0_5 = arith.constant 0 : index
    %c0_6 = arith.constant 0 : index
    %9 = memref.load %arg1[%c0_5, %c0_6] : memref<1x1xf32, #tpu.memory_space<smem>>
    %10 = arith.subf %7, %8 : vector<8x32xf32>
    %11 = arith.mulf %5, %10 : vector<8x32xf32>
    %cst = arith.constant dense<0.000000e+00> : vector<8xf32>
    %12 = vector.multi_reduction <add>, %11, %cst [1] : vector<8x32xf32> to vector<8xf32>
    %13 = vector.shape_cast %12 : vector<8xf32> to vector<8x1xf32>
    %14 = vector.broadcast %9 : f32 to vector<8x1xf32>
    %15 = arith.subf %14, %13 : vector<8x1xf32>
    %cst_7 = arith.constant 0.000000e+00 : f32
    %16 = vector.broadcast %cst_7 : f32 to vector<8x1xf32>
    %17 = arith.maximumf %15, %16 : vector<8x1xf32>
    %c8_i32 = arith.constant 8 : i32
    %18 = arith.muli %arg0, %c8_i32 : i32
    %19 = tpu.iota {dimensions = array<i32: 0>} : vector<8x1xi32>
    %20 = vector.broadcast %18 : i32 to vector<8x1xi32>
    %21 = arith.addi %20, %19 : vector<8x1xi32>
    %c8_i32_8 = arith.constant 8 : i32
    %22 = vector.broadcast %c8_i32_8 : i32 to vector<8x1xi32>
    %23 = arith.cmpi slt, %21, %22 : vector<8x1xi32>
    %cst_9 = arith.constant 0.000000e+00 : f32
    %24 = vector.broadcast %cst_9 : f32 to vector<8x1xf32>
    %25 = arith.select %23, %17, %24 : vector<8x1xi1>, vector<8x1xf32>
    %c0_10 = arith.constant 0 : index
    %c0_11 = arith.constant 0 : index
    %26 = memref.load %arg4[%c0_10, %c0_11] : memref<1x1xf32, #tpu.memory_space<smem>>
    %27 = vector.shape_cast %25 : vector<8x1xf32> to vector<1x8x1xf32>
    %cst_12 = arith.constant dense<0.000000e+00> : vector<1xf32>
    %28 = vector.multi_reduction <add>, %27, %cst_12 [1, 2] : vector<1x8x1xf32> to vector<1xf32>
    %29 = vector.shape_cast %28 : vector<1xf32> to vector<1x1x1xf32>
    %30 = vector.extract %29[0, 0, 0] : f32 from vector<1x1x1xf32>
    %31 = arith.addf %26, %30 : f32
    %c0_13 = arith.constant 0 : index
    %c0_14 = arith.constant 0 : index
    %32 = memref.load %arg4[%c0_13, %c0_14] : memref<1x1xf32, #tpu.memory_space<smem>>
    memref.store %31, %arg4[%c0_13, %c0_14] : memref<1x1xf32, #tpu.memory_space<smem>>
    %c0_i32_15 = arith.constant 0 : i32
    %33 = arith.cmpi eq, %arg0, %c0_i32_15 : i32
    %34 = arith.extui %33 : i1 to i32
    %c0_i32_16 = arith.constant 0 : i32
    %35 = arith.cmpi ne, %34, %c0_i32_16 : i32
    scf.if %35 {
      %c0_17 = arith.constant 0 : index
      %c0_18 = arith.constant 0 : index
      %36 = memref.load %arg4[%c0_17, %c0_18] : memref<1x1xf32, #tpu.memory_space<smem>>
      %cst_19 = arith.constant 8.000000e+00 : f32
      %37 = arith.divf %36, %cst_19 : f32
      %c0_20 = arith.constant 0 : index
      %c0_21 = arith.constant 0 : index
      %38 = memref.load %arg4[%c0_20, %c0_21] : memref<1x1xf32, #tpu.memory_space<smem>>
      memref.store %37, %arg4[%c0_20, %c0_21] : memref<1x1xf32, #tpu.memory_space<smem>>
    } else {
    }
    return
  }
  func.func @transform_0(%arg0: i32) -> (i32, i32) {
    %c0_i32 = arith.constant 0 : i32
    %c0_i32_0 = arith.constant 0 : i32
    %c0_i32_1 = arith.constant 0 : i32
    return %c0_i32, %c0_i32_0 : i32, i32
  }
  func.func @transform_1(%arg0: i32) -> (i32, i32, i32) {
    %c0_i32 = arith.constant 0 : i32
    %c0_i32_0 = arith.constant 0 : i32
    %c0_i32_1 = arith.constant 0 : i32
    return %arg0, %c0_i32, %c0_i32_0 : i32, i32, i32
  }
  func.func @transform_2(%arg0: i32) -> (i32, i32) {
    %c0_i32 = arith.constant 0 : i32
    %c0_i32_0 = arith.constant 0 : i32
    return %arg0, %c0_i32 : i32, i32
  }
  func.func @transform_3(%arg0: i32) -> (i32, i32) {
    %c0_i32 = arith.constant 0 : i32
    %c0_i32_0 = arith.constant 0 : i32
    %c0_i32_1 = arith.constant 0 : i32
    return %c0_i32, %c0_i32_0 : i32, i32
  }
}

</mosaic_0001>

<bundles_post_ra>
// kernel: tpu_custom_call.1
= control target key start
LH: loop header
LB: loop body
LE: loop exit
PB: predicated region body
PF: predicated region fallthrough
CT: control target
= control target key end

     0   :  { %9 = vsyncpa [#allocation4], 0  ;;  %s297_s0 = inlined_call_operand.<no memory space> [shape: f32[1,1], index: 0, kind: input, shape index: {}]   ;;  %s298_s1 = inlined_call_operand.hbm [shape: f32[8,2,32], index: 1, kind: input, shape index: {}]   ;;  %s299_s2 = inlined_call_operand.hbm [shape: f32[8,32], index: 2, kind: input, shape index: {}]   ;;  %s300_s3 = inlined_call_operand.hbm [shape: f32[1,1], index: 3, kind: output, shape index: {}]  }
   0x1   :  { %10 = vsyncpa [#allocation7], 0 }
   0x2   :  { %11 = vsyncpa [#allocation5], 0  ;;  %s258_s12 = smov [#allocation3]  }
   0x3   :  { %s19_s13 = sshll.u32 %s258_s12, 4  ;;  %s20_s13 = int_to_ptr.vmem [resolvable:$true] %s19_s13 }
   0x4   :  { %s212_s14 = scalar_lea.vmem %s20_s13, 256  ;;  %p217_p1 = scmp.lt.s32.totalorder %s20_s13, %s20_s13 }
   0x5   :  { %p213_p0 = scmp.ne.s32.totalorder %s20_s13, %s212_s14  ;;  %p218_p2 = scmp.lt.s32.totalorder %s212_s14, %s212_s14 }
   0x7   :  { %p219_p3 = por %p218_p2, %p217_p1 }
   0x9   :  { %p220_p4 = pnand %p219_p3, %p213_p0 }
   0xb   :  { %223 = shalt.err (!%p220_p4)
}
   0xc   :  { %s259_s15 = smov 32   ;;  %s260_s16 = smov 2  }
   0xd   :  { %25 = dma.hbm_to_vmem [thread:$0]  %s298_s1, 256, %s20_s13, [#allocation4], %s259_s15, %s259_s15, %s260_s16  }
   0xe   :  { %s261_s19 = smov [#allocation6]  }
   0xf   :  { %s32_s20 = sshll.u32 %s261_s19, 4  ;;  %s33_s20 = int_to_ptr.vmem [resolvable:$true] %s32_s20 }
  0x10   :  { %s232_s21 = scalar_lea.vmem %s33_s20, 128  ;;  %p237_p6 = scmp.lt.s32.totalorder %s33_s20, %s33_s20 }
  0x11   :  { %p233_p5 = scmp.ne.s32.totalorder %s33_s20, %s232_s21  ;;  %p238_p7 = scmp.lt.s32.totalorder %s232_s21, %s232_s21 }
  0x13   :  { %p239_p8 = por %p238_p7, %p237_p6 }
  0x15   :  { %p240_p9 = pnand %p239_p8, %p233_p5 }
  0x17   :  { %243 = shalt.err (!%p240_p9)
}
  0x18   :  { %35 = dma.hbm_to_vmem [thread:$0]  %s299_s2, 128, %s33_s20, [#allocation7]  }
  0x19   :  { %252 = dma.done.wait [#allocation4], 256  }
  0x1a   :  { %253 = vsyncadd [#allocation4], 4294967040 }
  0x1b   :  { %254 = dma.done.wait [#allocation7], 128  }
  0x1c   :  { %255 = vsyncadd [#allocation7], 4294967168  ;;  %v48_v0 = vld [vmem:[#allocation3] sm:$0x3]  ;;  %v49_v1 = vld [vmem:[#allocation3 + $0x2] sm:$0x3]  ;;  %v148_v55 = vstv %s297_s0 }
  0x1d   :  { %v50_v2 = vld [vmem:[#allocation3 + $0x4] sm:$0x3]  ;;  %v51_v3 = vld [vmem:[#allocation3 + $0x6] sm:$0x3]  ;;  %v52_v4 = vld [vmem:[#allocation3 + $0x8] sm:$0x3] }
  0x1e   :  { %vm123_vm0 = vcmask 1041409   ;;  %v53_v5 = vld [vmem:[#allocation3 + $0xa] sm:$0x3]  ;;  %v54_v6 = vld [vmem:[#allocation3 + $0xc] sm:$0x3]  ;;  %v56_v7 = vld [vmem:[#allocation6] sm:$0xff] }
  0x1f   :  { %vm126_vm1 = vcmask 1042434   ;;  %v55_v8 = vld [vmem:[#allocation3 + $0xe] sm:$0x3]  ;;  %v59_v9 = vrot.slane %v56_v7, 7  ;;  %v60_v10 = vrot.slane %v56_v7, 1  ;;  %v61_v11 = vrot.slane %v56_v7, 2 }
  0x20   :  { %v62_v12 = vrot.slane %v56_v7, 3  ;;  %v63_v13 = vrot.slane %v56_v7, 4  ;;  %v64_v14 = vrot.slane %v56_v7, 5  ;;  %v65_v15 = vrot.slane %v56_v7, 6  ;;  %s262_s26 = smov [#allocation8]  }
  0x21   :  { %v75_v16 = vsub.f32 %v49_v1, %v56_v7  ;;  %v74_v17 = vsub.f32 %v48_v0, %v59_v9  ;;  %v76_v18 = vsub.f32 %v50_v2, %v60_v10  ;;  %v77_v19 = vsub.f32 %v51_v3, %v61_v11 }
  0x22   :  { %v78_v20 = vsub.f32 %v52_v4, %v62_v12  ;;  %v79_v21 = vsub.f32 %v53_v5, %v63_v13  ;;  %v80_v22 = vsub.f32 %v54_v6, %v64_v14  ;;  %v81_v23 = vsub.f32 %v55_v8, %v65_v15 }
  0x23   :  { %v91_v24 = vrot.slane %v75_v16, 1  ;;  %v90_v25 = vrot.slane %v74_v17, 1  ;;  %v92_v26 = vrot.slane %v76_v18, 1  ;;  %v93_v27 = vrot.slane %v77_v19, 1 }
  0x24   :  { %v94_v28 = vrot.slane %v78_v20, 1  ;;  %v95_v29 = vrot.slane %v79_v21, 1  ;;  %v96_v30 = vrot.slane %v80_v22, 1  ;;  %v97_v31 = vrot.slane %v81_v23, 1 }
  0x25   :  { %v107_v32 = vmul.f32 %v91_v24, %v49_v1  ;;  %v106_v33 = vmul.f32 %v90_v25, %v48_v0  ;;  %v108_v34 = vmul.f32 %v92_v26, %v50_v2  ;;  %v109_v35 = vmul.f32 %v93_v27, %v51_v3 }
  0x26   :  { %v110_v36 = vmul.f32 %v94_v28, %v52_v4  ;;  %v111_v37 = vmul.f32 %v95_v29, %v53_v5  ;;  %v112_v38 = vmul.f32 %v96_v30, %v54_v6  ;;  %v113_v39 = vmul.f32 %v97_v31, %v55_v8 }
  0x27   :  { %v122_v40 = vrot.slane %v107_v32, 7  ;;  %v125_v41 = vrot.slane %v108_v34, 6  ;;  %v128_v42 = vrot.slane %v109_v35, 5  ;;  %vm129_vm2 = vcmask 1043459  }
  0x28   :  { %v131_v43 = vrot.slane %v110_v36, 4  ;;  %vm132_vm3 = vcmask 1044484   ;;  %v134_v45 = vrot.slane %v111_v37, 3  ;;  %vm135_vm4 = vcmask 1045509  }
  0x29   :  { %v124_v44 = vsel %vm123_vm0, %v122_v40, %v106_v33  ;;  %v137_v47 = vrot.slane %v112_v38, 2  ;;  %vm138_vm5 = vcmask 1046534   ;;  %v140_v49 = vrot.slane %v113_v39, 1 }
  0x2a   :  { %v127_v46 = vsel %vm126_vm1, %v125_v41, %v124_v44  ;;  %vm141_vm6 = vcmask 1047559   ;;  %vm144_vm7 = vcmask 261120   ;;  %vm159_vm8 = vcmask 7168  }
  0x2b   :  { %v130_v48 = vsel %vm129_vm2, %v128_v42, %v127_v46 }
  0x2c   :  { %v133_v50 = vsel %vm132_vm3, %v131_v43, %v130_v48 }
  0x2d   :  { %v136_v51 = vsel %vm135_vm4, %v134_v45, %v133_v50 }
  0x2e   :  { %v139_v52 = vsel %vm138_vm5, %v137_v47, %v136_v51 }
  0x2f   :  { %v142_v53 = vsel %vm141_vm6, %v140_v49, %v139_v52 }
  0x30   :  { %v145_v54 = vsel %vm144_vm7, %v142_v53, 0.0 }
  0x31   :  { %146 = vadd.xlane.f32.xlu0 %v145_v54 }
  0xba   :  { %v147_v56 = vpop.xlane.xlu0 %146 }
  0xbb   :  { %v149_v57 = vsub.f32 %v148_v55, %v147_v56 }
  0xbd   :  { %v150_v58 = vmax.f32 %v149_v57, 0.0 }
  0xbf   :  { %v160_v59 = vsel %vm159_vm8, %v150_v58, 0.0 }
  0xc0   :  { %161 = vadd.xlane.f32.xlu0 %v160_v59 }
 0x149   :  { %v162_v60 = vpop.xlane.xlu0 %161 }
 0x14a   :  { %v163_v61 = vrot.slane %v162_v60, 4 }
 0x14c   :  { %v164_v62 = vadd.f32 %v163_v61, %v162_v60 }
 0x14e   :  { %v165_v63 = vrot.slane %v164_v62, 2 }
 0x150   :  { %v166_v0 = vadd.f32 %v165_v63, %v164_v62 }
 0x152   :  { %v167_v1 = vrot.slane %v166_v0, 1 }
 0x154   :  { %v168_v2 = vadd.f32 %v167_v1, %v166_v0 }
 0x156   :  { %196 = vpush %v168_v2 }
 0x187   :  { %s197_s24 = spop %196 }
 0x188   :  { %s179_s25 = smul.f32 0.125, %s197_s24 }
 0x18a   :  { %180 = sst [smem:[#allocation8]] %s179_s25 }
 0x18b   :  { %188 = dma.smem_to_hbm %s262_s26, 16, %s300_s3, [#allocation5]  }
 0x18c   :  { %256 = dma.done.wait [#allocation5], 16  }
 0x18d   :  { %257 = vsyncadd [#allocation5], 4294967280 }
 0x18e   :  { %192 = sfence }
 0x18f   :  { %193 = vsyncpa [#allocation4], 1 }
 0x190   :  { %194 = vsyncpa [#allocation7], 1 }
 0x191   :  { %195 = vsyncpa [#allocation5], 1 }

</bundles_post_ra>
